<compile_context>
chip_gen: v5e
topology: v5e:2x2
jax: 0.10.0
libtpu: 0.0.40
codegen_flags: <defaults>
</compile_context>

<pallas_src>
import functools
import math
import numpy as np
import jax
import jax.numpy as jnp
from jax.experimental import pallas as pl
from jax.experimental.pallas import tpu as pltpu

_LANE = 128                      # lane width
_MAX_LANE_BLOCK = 16384          # primary tuning knob: lanes per grid step
_VMEM_STREAM_BUDGET = 12 << 20   # per-step streaming budget (fits v5e's 16 MiB default)


def _round_up(x, m):
    return (x + m - 1) // m * m


def _group_down_conv_kernel(xpk_ref, wpk_ref, shift_ref, w1_ref, bias_ref, o_ref, *, fold):
    """One lane-block of the flattened (N*Hout*Wout) spatial axis per grid step.

    xpk_ref  : (P, G, MB)  im2col'd stride-2 taps; G sublanes carry either C
                           channels (unpacked) or two taps x C channels (packed)
    wpk_ref  : (P, G, 1)   matching depthwise weights (BN1 scale folded in)
    shift_ref: (G, 1)      folded BN1 shift
    w1_ref   : (Cout, G)   1x1 conv weights (BN2 scale folded in; zero right
                           half in the packed layout)
    bias_ref : (Cout, 1)   1x1 bias with BN2 shift folded in
    o_ref    : (Cout, MB)
    fold     : static; >0 means sublanes [fold:2*fold) hold the odd-tap partial
               sums that must be folded into sublanes [0:fold) before the ReLU.
    """
    P = xpk_ref.shape[0]

    # ---- depthwise 3x3, stride 2: P aligned full-tile VPU FMAs, tree-summed ----
    terms = [xpk_ref[p] * wpk_ref[p] for p in range(P)]
    while len(terms) > 1:
        nxt = [terms[i] + terms[i + 1] for i in range(0, len(terms) - 1, 2)]
        if len(terms) % 2:
            nxt.append(terms[-1])
        terms = nxt
    acc = terms[0]                                       # (G, MB)

    if fold:
        # fold even-tap / odd-tap halves of the sublane group (XLU sublane roll)
        acc = acc + pltpu.roll(acc, shift=fold, axis=0)

    # ---- BN1 shift (scale folded into weights) + ReLU ----
    y = jnp.maximum(acc + shift_ref[...], 0.0)           # (G, MB)

    # ---- 1x1 conv (+ folded BN2 scale) on the MXU (otherwise-idle slot) ----
    z = jnp.dot(w1_ref[...], y, preferred_element_type=jnp.float32)   # (Cout, MB)

    # ---- bias (BN2 shift folded in) + ReLU ----
    o_ref[...] = jnp.maximum(z + bias_ref[...], 0.0)


def group_down_conv(x_nchw, w_dw, gamma1, beta1, mean1, var1,
                    w_pw, b_pw, gamma2, beta2, mean2, var2, eps=1e-5):
    """Pallas implementation of GroupDownConvLayer.forward (kernel=3, stride=2, pad=1)."""
    N, C, H, W = x_nchw.shape
    Cout = w_pw.shape[0]
    k, stride, pad = 3, 2, 1
    Hout = (H + 2 * pad - k) // stride + 1
    Wout = (W + 2 * pad - k) // stride + 1
    M = N * Hout * Wout

    x = x_nchw.astype(jnp.float32)
    xp = jnp.pad(x, ((0, 0), (0, 0), (pad, pad), (pad, pad)))   # (N, C, Hp, Wp)

    # im2col-by-tap (pure layout plumbing on the XLA side): 9 shifted stride-2 views
    taps = []
    for kh in range(3):
        for kw in range(3):
            taps.append(xp[:, :, kh:kh + 2 * Hout:2, kw:kw + 2 * Wout:2])

    # fold eval-mode BN into weights / bias (one-time constant folding, tiny tensors)
    scale1 = gamma1 / jnp.sqrt(var1 + eps)                                   # (C,)
    shift1 = (beta1 - mean1 * scale1).reshape(C, 1).astype(jnp.float32)      # (C, 1)
    wdw = (w_dw[:, 0].reshape(C, 9) * scale1[:, None]).astype(jnp.float32)   # (C, 9)
    scale2 = gamma2 / jnp.sqrt(var2 + eps)                                   # (Cout,)
    w1 = (w_pw[:, :, 0, 0] * scale2[:, None]).astype(jnp.float32)            # (Cout, C)
    bias2 = (b_pw * scale2 + beta2 - mean2 * scale2).reshape(Cout, 1).astype(jnp.float32)

    packed = (2 * C == 8)    # pack two taps per 8-sublane f32 vreg group
    if packed:
        P, G, fold = 5, 2 * C, C
        taps.append(jnp.zeros_like(taps[0]))                        # zero partner for tap 9
        xpk = jnp.stack(taps, axis=0)                               # (10, N, C, Ho, Wo)
        xpk = xpk.reshape(P, 2, N, C, Hout, Wout)
        xpk = xpk.transpose(0, 1, 3, 2, 4, 5).reshape(P, G, M)      # (5, 2C, M)
        wdw10 = jnp.concatenate([wdw, jnp.zeros((C, 1), jnp.float32)], axis=1)   # (C, 10)
        wpk = wdw10.T.reshape(P, G, 1)                              # (5, 2C, 1)
        shift_in = jnp.concatenate([shift1, shift1], axis=0)        # (2C, 1)
        w1_in = jnp.concatenate([w1, jnp.zeros((Cout, C), jnp.float32)], axis=1)  # (Cout, 2C)
    else:
        P, G, fold = 9, C, 0
        xpk = jnp.stack(taps, axis=0).transpose(0, 2, 1, 3, 4).reshape(P, G, M)
        wpk = wdw.T.reshape(P, G, 1)
        shift_in = shift1
        w1_in = w1

    # lane blocking: largest block inside the streaming VMEM budget; >=2 grid
    # blocks when the spatial extent allows (v7x megacore sharding)
    Gpad, Cpad = _round_up(G, 8), _round_up(Cout, 8)
    bytes_per_lane = 4 * (2 * P * Gpad + 2 * Cpad + 4 * max(Gpad, Cpad))
    vmem_cap = max(_LANE, (_VMEM_STREAM_BUDGET // bytes_per_lane) // _LANE * _LANE)

    M_aligned = _round_up(M, _LANE)
    MB = min(_MAX_LANE_BLOCK, vmem_cap, M_aligned)
    if M_aligned >= 2 * _LANE and MB >= M_aligned:
        MB = _round_up(M_aligned // 2, _LANE)
    Mpad = _round_up(M_aligned, MB)
    if Mpad != M:
        xpk = jnp.pad(xpk, ((0, 0), (0, 0), (0, Mpad - M)))

    vmem_limit = int(min(max(2 * MB * bytes_per_lane, 16 << 20), 64 << 20))

    out = pl.pallas_call(
        functools.partial(_group_down_conv_kernel, fold=fold),
        out_shape=jax.ShapeDtypeStruct((Cout, Mpad), jnp.float32),
        grid=(Mpad // MB,),
        in_specs=[
            pl.BlockSpec((P, G, MB), lambda m: (0, 0, m)),
            pl.BlockSpec((P, G, 1), lambda m: (0, 0, 0)),
            pl.BlockSpec((G, 1), lambda m: (0, 0)),
            pl.BlockSpec((Cout, G), lambda m: (0, 0)),
            pl.BlockSpec((Cout, 1), lambda m: (0, 0)),
        ],
        out_specs=pl.BlockSpec((Cout, MB), lambda m: (0, m)),
        compiler_params=pltpu.CompilerParams(
            dimension_semantics=("parallel",),
            vmem_limit_bytes=vmem_limit,
        ),
    )(xpk, wpk, shift_in, w1_in, bias2)

    # padded lanes (Mpad > M) hold garbage after the ReLUs — always slice first
    out = out[:, :M].reshape(Cout, N, Hout, Wout).transpose(1, 0, 2, 3)
    return out


def _reference(x_nchw, w_dw, gamma1, beta1, mean1, var1,
               w_pw, b_pw, gamma2, beta2, mean2, var2, eps=1e-5):
    """Plain-JAX reference mirroring the PyTorch module (eval-mode BN)."""
    C = x_nchw.shape[1]
    dn = ('NCHW', 'OIHW', 'NCHW')
    y = jax.lax.conv_general_dilated(x_nchw, w_dw, (2, 2), ((1, 1), (1, 1)),
                                     feature_group_count=C, dimension_numbers=dn)
    y = (y - mean1[None, :, None, None]) / jnp.sqrt(var1 + eps)[None, :, None, None]
    y = y * gamma1[None, :, None, None] + beta1[None, :, None, None]
    y = jnp.maximum(y, 0.0)
    z = jax.lax.conv_general_dilated(y, w_pw, (1, 1), ((0, 0), (0, 0)),
                                     dimension_numbers=dn)
    z = z + b_pw[None, :, None, None]
    z = (z - mean2[None, :, None, None]) / jnp.sqrt(var2 + eps)[None, :, None, None]
    z = z * gamma2[None, :, None, None] + beta2[None, :, None, None]
    return jnp.maximum(z, 0.0)


if __name__ == "__main__":
    N, C, Cout, H, W = 2, 4, 8, 16, 16
    key = jax.random.PRNGKey(0)
    ks = jax.random.split(key, 4)

    x = jax.random.normal(ks[0], (N, C, H, W), jnp.float32)

    # depthwise conv weight (inc, 1, 3, 3), no bias
    w_dw = jax.random.normal(ks[1], (C, 1, 3, 3), jnp.float32) * 0.3
    # pointwise 1x1 conv weight (outc, inc, 1, 1) + bias
    w_pw = jax.random.normal(ks[2], (Cout, C, 1, 1), jnp.float32) * 0.3
    b_pw = jax.random.normal(ks[3], (Cout,), jnp.float32) * 0.1

    # BatchNorm params (deterministic, eval-mode running stats)
    gamma1 = 1.0 + 0.05 * jnp.arange(C, dtype=jnp.float32)
    beta1 = 0.02 * jnp.arange(C, dtype=jnp.float32)
    mean1 = 0.03 * jnp.arange(C, dtype=jnp.float32)
    var1 = 1.0 + 0.10 * jnp.arange(C, dtype=jnp.float32)
    gamma2 = 1.0 + 0.04 * jnp.arange(Cout, dtype=jnp.float32)
    beta2 = -0.01 * jnp.arange(Cout, dtype=jnp.float32)
    mean2 = 0.02 * jnp.arange(Cout, dtype=jnp.float32)
    var2 = 1.0 + 0.05 * jnp.arange(Cout, dtype=jnp.float32)

    # sanity: module's reported output size (matches conv output here)
    out_h = math.ceil((H + 2 * 1 - 3) / 2)
    out_w = math.ceil((W + 2 * 1 - 3) / 2)

    out = group_down_conv(x, w_dw, gamma1, beta1, mean1, var1,
                          w_pw, b_pw, gamma2, beta2, mean2, var2)
    out = jax.block_until_ready(out)

    ref = _reference(x, w_dw, gamma1, beta1, mean1, var1,
                     w_pw, b_pw, gamma2, beta2, mean2, var2)

    assert out.shape == (N, Cout, out_h, out_w), out.shape
    # slight slack vs 1e-4: in-kernel MXU 1x1 + pairwise tap summation reorder
    np.testing.assert_allclose(np.asarray(out), np.asarray(ref), rtol=2e-4, atol=2e-4)
    print("KERNEL_OK")
</pallas_src>

<mosaic_0001>
module attributes {stable_mosaic.version = 11 : i64} {
  func.func @_group_down_conv_kernel(%arg0: i32, %arg1: memref<5x8x128xf32, #tpu.memory_space<vmem>>, %arg2: memref<5x8x1xf32, #tpu.memory_space<vmem>>, %arg3: memref<8x1xf32, #tpu.memory_space<vmem>>, %arg4: memref<8x8xf32, #tpu.memory_space<vmem>>, %arg5: memref<8x1xf32, #tpu.memory_space<vmem>>, %arg6: memref<8x128xf32, #tpu.memory_space<vmem>>) attributes {dimension_semantics = [#tpu.dimension_semantics<parallel>], iteration_bounds = array<i64: 1>, scalar_prefetch = 0 : i64, scratch_operands = 0 : i64, tpu.core_type = #tpu.core_type<tc>, window_params = [{transform_indices = @transform_0, window_bounds = array<i64: 5, 8, 128>}, {pipeline_mode = #tpu.pipeline_mode<synchronous>, transform_indices = @transform_1, window_bounds = array<i64: 5, 8, 1>}, {pipeline_mode = #tpu.pipeline_mode<synchronous>, transform_indices = @transform_2, window_bounds = array<i64: 8, 1>}, {pipeline_mode = #tpu.pipeline_mode<synchronous>, transform_indices = @transform_3, window_bounds = array<i64: 8, 8>}, {pipeline_mode = #tpu.pipeline_mode<synchronous>, transform_indices = @transform_4, window_bounds = array<i64: 8, 1>}, {transform_indices = @transform_5, window_bounds = array<i64: 8, 128>}]} {
    %c0 = arith.constant 0 : index
    %c0_0 = arith.constant 0 : index
    %c0_1 = arith.constant 0 : index
    %0 = vector.load %arg1[%c0, %c0_0, %c0_1] : memref<5x8x128xf32, #tpu.memory_space<vmem>>, vector<1x8x128xf32>
    %1 = vector.shape_cast %0 : vector<1x8x128xf32> to vector<8x128xf32>
    %c0_2 = arith.constant 0 : index
    %c0_3 = arith.constant 0 : index
    %c0_4 = arith.constant 0 : index
    %2 = vector.load %arg2[%c0_2, %c0_3, %c0_4] : memref<5x8x1xf32, #tpu.memory_space<vmem>>, vector<1x8x1xf32>
    %3 = vector.shape_cast %2 : vector<1x8x1xf32> to vector<8x1xf32>
    %4 = vector.broadcast %3 : vector<8x1xf32> to vector<8x128xf32>
    %5 = arith.mulf %1, %4 : vector<8x128xf32>
    %c1 = arith.constant 1 : index
    %c0_5 = arith.constant 0 : index
    %c0_6 = arith.constant 0 : index
    %6 = vector.load %arg1[%c1, %c0_5, %c0_6] : memref<5x8x128xf32, #tpu.memory_space<vmem>>, vector<1x8x128xf32>
    %7 = vector.shape_cast %6 : vector<1x8x128xf32> to vector<8x128xf32>
    %c1_7 = arith.constant 1 : index
    %c0_8 = arith.constant 0 : index
    %c0_9 = arith.constant 0 : index
    %8 = vector.load %arg2[%c1_7, %c0_8, %c0_9] : memref<5x8x1xf32, #tpu.memory_space<vmem>>, vector<1x8x1xf32>
    %9 = vector.shape_cast %8 : vector<1x8x1xf32> to vector<8x1xf32>
    %10 = vector.broadcast %9 : vector<8x1xf32> to vector<8x128xf32>
    %11 = arith.mulf %7, %10 : vector<8x128xf32>
    %c2 = arith.constant 2 : index
    %c0_10 = arith.constant 0 : index
    %c0_11 = arith.constant 0 : index
    %12 = vector.load %arg1[%c2, %c0_10, %c0_11] : memref<5x8x128xf32, #tpu.memory_space<vmem>>, vector<1x8x128xf32>
    %13 = vector.shape_cast %12 : vector<1x8x128xf32> to vector<8x128xf32>
    %c2_12 = arith.constant 2 : index
    %c0_13 = arith.constant 0 : index
    %c0_14 = arith.constant 0 : index
    %14 = vector.load %arg2[%c2_12, %c0_13, %c0_14] : memref<5x8x1xf32, #tpu.memory_space<vmem>>, vector<1x8x1xf32>
    %15 = vector.shape_cast %14 : vector<1x8x1xf32> to vector<8x1xf32>
    %16 = vector.broadcast %15 : vector<8x1xf32> to vector<8x128xf32>
    %17 = arith.mulf %13, %16 : vector<8x128xf32>
    %c3 = arith.constant 3 : index
    %c0_15 = arith.constant 0 : index
    %c0_16 = arith.constant 0 : index
    %18 = vector.load %arg1[%c3, %c0_15, %c0_16] : memref<5x8x128xf32, #tpu.memory_space<vmem>>, vector<1x8x128xf32>
    %19 = vector.shape_cast %18 : vector<1x8x128xf32> to vector<8x128xf32>
    %c3_17 = arith.constant 3 : index
    %c0_18 = arith.constant 0 : index
    %c0_19 = arith.constant 0 : index
    %20 = vector.load %arg2[%c3_17, %c0_18, %c0_19] : memref<5x8x1xf32, #tpu.memory_space<vmem>>, vector<1x8x1xf32>
    %21 = vector.shape_cast %20 : vector<1x8x1xf32> to vector<8x1xf32>
    %22 = vector.broadcast %21 : vector<8x1xf32> to vector<8x128xf32>
    %23 = arith.mulf %19, %22 : vector<8x128xf32>
    %c4 = arith.constant 4 : index
    %c0_20 = arith.constant 0 : index
    %c0_21 = arith.constant 0 : index
    %24 = vector.load %arg1[%c4, %c0_20, %c0_21] : memref<5x8x128xf32, #tpu.memory_space<vmem>>, vector<1x8x128xf32>
    %25 = vector.shape_cast %24 : vector<1x8x128xf32> to vector<8x128xf32>
    %c4_22 = arith.constant 4 : index
    %c0_23 = arith.constant 0 : index
    %c0_24 = arith.constant 0 : index
    %26 = vector.load %arg2[%c4_22, %c0_23, %c0_24] : memref<5x8x1xf32, #tpu.memory_space<vmem>>, vector<1x8x1xf32>
    %27 = vector.shape_cast %26 : vector<1x8x1xf32> to vector<8x1xf32>
    %28 = vector.broadcast %27 : vector<8x1xf32> to vector<8x128xf32>
    %29 = arith.mulf %25, %28 : vector<8x128xf32>
    %30 = arith.addf %5, %11 : vector<8x128xf32>
    %31 = arith.addf %17, %23 : vector<8x128xf32>
    %32 = arith.addf %30, %31 : vector<8x128xf32>
    %33 = arith.addf %32, %29 : vector<8x128xf32>
    %c4_i32 = arith.constant 4 : i32
    %34 = tpu.dynamic_rotate %33 by %c4_i32 dim 0 : vector<8x128xf32>, i32 -> vector<8x128xf32>
    %35 = arith.addf %33, %34 : vector<8x128xf32>
    %c0_25 = arith.constant 0 : index
    %c0_26 = arith.constant 0 : index
    %36 = vector.load %arg3[%c0_25, %c0_26] : memref<8x1xf32, #tpu.memory_space<vmem>>, vector<8x1xf32>
    %37 = vector.broadcast %36 : vector<8x1xf32> to vector<8x128xf32>
    %38 = arith.addf %35, %37 : vector<8x128xf32>
    %cst = arith.constant 0.000000e+00 : f32
    %39 = vector.broadcast %cst : f32 to vector<8x128xf32>
    %40 = arith.maximumf %38, %39 : vector<8x128xf32>
    %c0_27 = arith.constant 0 : index
    %c0_28 = arith.constant 0 : index
    %41 = vector.load %arg4[%c0_27, %c0_28] : memref<8x8xf32, #tpu.memory_space<vmem>>, vector<8x8xf32>
    %cst_29 = arith.constant dense<0.000000e+00> : vector<8x128xf32>
    %42 = tpu.matmul %41, %40, %cst_29 {dimension_numbers = #tpu.dot_dimension_numbers<[1], [0], [0], [1], [0, 0, 1, 1], [], []>} : vector<8x8xf32>, vector<8x128xf32>, vector<8x128xf32> -> vector<8x128xf32>
    %c0_30 = arith.constant 0 : index
    %c0_31 = arith.constant 0 : index
    %43 = vector.load %arg5[%c0_30, %c0_31] : memref<8x1xf32, #tpu.memory_space<vmem>>, vector<8x1xf32>
    %44 = vector.broadcast %43 : vector<8x1xf32> to vector<8x128xf32>
    %45 = arith.addf %42, %44 : vector<8x128xf32>
    %cst_32 = arith.constant 0.000000e+00 : f32
    %46 = vector.broadcast %cst_32 : f32 to vector<8x128xf32>
    %47 = arith.maximumf %45, %46 : vector<8x128xf32>
    %c0_33 = arith.constant 0 : index
    %c0_34 = arith.constant 0 : index
    %48 = vector.load %arg6[%c0_33, %c0_34] : memref<8x128xf32, #tpu.memory_space<vmem>>, vector<8x128xf32>
    tpu.vector_store %arg6[%c0_33, %c0_34], %47 {strides = array<i32>} : memref<8x128xf32, #tpu.memory_space<vmem>>, vector<8x128xf32>,
    return
  }
  func.func @transform_0(%arg0: i32) -> (i32, i32, i32) {
    %c0_i32 = arith.constant 0 : i32
    %c0_i32_0 = arith.constant 0 : i32
    %c0_i32_1 = arith.constant 0 : i32
    return %c0_i32, %c0_i32_0, %arg0 : i32, i32, i32
  }
  func.func @transform_1(%arg0: i32) -> (i32, i32, i32) {
    %c0_i32 = arith.constant 0 : i32
    %c0_i32_0 = arith.constant 0 : i32
    %c0_i32_1 = arith.constant 0 : i32
    %c0_i32_2 = arith.constant 0 : i32
    return %c0_i32, %c0_i32_0, %c0_i32_1 : i32, i32, i32
  }
  func.func @transform_2(%arg0: i32) -> (i32, i32) {
    %c0_i32 = arith.constant 0 : i32
    %c0_i32_0 = arith.constant 0 : i32
    %c0_i32_1 = arith.constant 0 : i32
    return %c0_i32, %c0_i32_0 : i32, i32
  }
  func.func @transform_3(%arg0: i32) -> (i32, i32) {
    %c0_i32 = arith.constant 0 : i32
    %c0_i32_0 = arith.constant 0 : i32
    %c0_i32_1 = arith.constant 0 : i32
    return %c0_i32, %c0_i32_0 : i32, i32
  }
  func.func @transform_4(%arg0: i32) -> (i32, i32) {
    %c0_i32 = arith.constant 0 : i32
    %c0_i32_0 = arith.constant 0 : i32
    %c0_i32_1 = arith.constant 0 : i32
    return %c0_i32, %c0_i32_0 : i32, i32
  }
  func.func @transform_5(%arg0: i32) -> (i32, i32) {
    %c0_i32 = arith.constant 0 : i32
    %c0_i32_0 = arith.constant 0 : i32
    return %c0_i32, %arg0 : i32, i32
  }
}

</mosaic_0001>

<bundles_post_ra>
// kernel: tpu_custom_call.1
= control target key start
LH: loop header
LB: loop body
LE: loop exit
PB: predicated region body
PF: predicated region fallthrough
CT: control target
= control target key end

     0   :  { %v172_v2 = vmov 0   ;;  %s246_s0 = inlined_call_operand.vmem [shape: f32[5,8,128], index: 0, kind: input, shape index: {}]   ;;  %s247_s1 = inlined_call_operand.vmem [shape: f32[5,8,1], index: 1, kind: input, shape index: {}]   ;;  %s248_s2 = inlined_call_operand.vmem [shape: f32[8,1], index: 2, kind: input, shape index: {}]   ;;  %s249_s3 = inlined_call_operand.vmem [shape: f32[8,8], index: 3, kind: input, shape index: {}]   ;;  %s250_s4 = inlined_call_operand.vmem [shape: f32[8,1], index: 4, kind: input, shape index: {}]   ;;  %s251_s5 = inlined_call_operand.hbm [shape: f32[8,128], index: 5, kind: output, shape index: {}]  }
   0x1   :  { %v135_v0 = vld [vmem:[%s247_s1 + $0x10] sm:$0xff]  ;;  %v22_v1 = vld [vmem:[%s247_s1] sm:$0xff]  ;;  %144 = vset.pattern.permute.xlu1 %v172_v2  ;;  %143 = vset.pattern.permute.xlu0 %v172_v2 }
   0x2   :  { %v139_v3 = vld [vmem:[%s247_s1 + $0x20] sm:$0xff]  ;;  %45 = vperm.xlu1 %144, %v135_v0   ;;  %25 = vperm.xlu0 %143, %v22_v1  }
   0x3   :  { %10 = vsyncpa [#allocation3], 0  ;;  %145 = vset.pattern.permute.xlu2 %v172_v2  ;;  %v137_v4 = vld [vmem:[%s247_s1 + $0x18] sm:$0xff]  ;;  %v133_v5 = vld [vmem:[%s247_s1 + $0x8] sm:$0xff]  ;;  %vm90_vm0 = vcmask 64512   ;;  %s123_s19 = sshll.u32 %s251_s5, 4  ;;  %s124_s19 = int_to_ptr.hbm [resolvable:$true] %s123_s19 }
   0x4   :  { %65 = vperm.xlu2 %145, %v139_v3   ;;  %v75_v6 = vld [vmem:[%s248_s2] sm:$0xff]  ;;  %v134_v10 = vld [vmem:[%s246_s0 + $0x10] sm:$0xff]  ;;  %v136_v12 = vld [vmem:[%s246_s0 + $0x18] sm:$0xff] }
   0x5   :  { %v84_v7 = vld [vmem:[%s250_s4] sm:$0xff]  ;;  %v132_v13 = vld [vmem:[%s246_s0 + $0x8] sm:$0xff] }
   0x6   :  { %v21_v11 = vld [vmem:[%s246_s0] sm:$0xff] }
   0x7   :  { %v138_v14 = vld [vmem:[%s246_s0 + $0x20] sm:$0xff]  ;;  %s173_s0 = smov [#allocation2]  }
   0x8   :  { %v83_v32 = vld [vmem:[%s249_s3] sm:$0xff]  ;;  %s121_s16 = sshll.u32 %s173_s0, 4  ;;  %s122_s16 = int_to_ptr.vmem [resolvable:$true] %s121_s16 }
   0xa   :  { %55 = vperm.xlu1 %144, %v137_v4   ;;  %35 = vperm.xlu0 %143, %v133_v5  }
   0xc   :  { %78 = vperm.xlu2 %145, %v75_v6  }
  0x12   :  { %87 = vperm.xlu0 %143, %v84_v7  }
  0x5e   :  { %v66_v21 = vpop.permute.xlu2 %65 }
  0x5f   :  { %v68_v22 = vmul.f32 %v138_v14, %v66_v21 }
  0x66   :  { %v79_v29 = vpop.permute.xlu2 %78 }
  0x74   :  { %v46_v8 = vpop.permute.xlu1 %45  ;;  %v26_v9 = vpop.permute.xlu0 %25 }
  0x75   :  { %v48_v17 = vmul.f32 %v134_v10, %v46_v8  ;;  %v28_v18 = vmul.f32 %v26_v9, %v21_v11 }
  0x7c   :  { %v56_v15 = vpop.permute.xlu1 %55  ;;  %v36_v16 = vpop.permute.xlu0 %35 }
  0x7d   :  { %v58_v19 = vmul.f32 %v136_v12, %v56_v15  ;;  %v38_v20 = vmul.f32 %v132_v13, %v36_v16 }
  0x7f   :  { %v70_v23 = vadd.f32 %v58_v19, %v48_v17  ;;  %v69_v24 = vadd.f32 %v38_v20, %v28_v18 }
  0x81   :  { %v71_v25 = vadd.f32 %v70_v23, %v69_v24 }
  0x83   :  { %v72_v26 = vadd.f32 %v71_v25, %v68_v22 }
  0x84   :  { %v88_v33 = vpop.permute.xlu0 %87 }
  0x85   :  { %v73_v27 = vrot.slane %v72_v26, 4 }
  0x87   :  { %v74_v28 = vadd.f32 %v73_v27, %v72_v26 }
  0x89   :  { %v81_v30 = vadd.f32 %v79_v29, %v74_v28 }
  0x8b   :  { %v82_v31 = vmax.f32 %v81_v30, 0.0 }
  0x8d   :  { %109 = vmatpush.msra.mxu0 %v82_v31 }
  0x8e   :  { %140 = vmatmul.msk.f32.vlgmr.msra.gmra.mxu0 %vm90_vm0, %v83_v32 }
 0x10b   :  { %v111_v34 = vpop.f32.mrf.mxu0 }
 0x10c   :  { %v112_v35 = vadd.f32 %v111_v34, %v88_v33 }
 0x10e   :  { %v114_v36 = vmax.f32 %v112_v35, 0.0 }
 0x110   :  { %115 = vst [vmem:[#allocation2] sm:$0xff] %v114_v36 }
 0x111   :  { %126 = dma.vmem_to_hbm [thread:$0]  %s122_s16, 128, %s124_s19, [#allocation3]  }
 0x112   :  { %170 = dma.done.wait [#allocation3], 128  }
 0x113   :  { %171 = vsyncadd [#allocation3], 4294967168 }
 0x114   :  { %131 = vsyncpa [#allocation3], 1 }

</bundles_post_ra>
